<compile_context>
chip_gen: v6e
topology: v6e:2x2x1
jax: 0.10.0
libtpu: 0.0.40
codegen_flags: <defaults>
</compile_context>

<pallas_src>
import functools

import jax
import jax.numpy as jnp
from jax.experimental import pallas as pl
from jax.experimental.pallas import tpu as pltpu


def _round_up(x, m):
    return ((x + m - 1) // m) * m


def critic_kernel(obs_ref, w0_ref, b_ref, w1_ref, w2_ref, out_ref, *, h0, h1):
    """Feature-major MLP tile: all activations are (features, TB)."""
    x = obs_ref[...]                       # (obs_dim, TB), f32 or bf16
    b = b_ref[...]                         # (h0 + h1 + out_dim, 1), f32

    # Row (sublane) slices, all starting at lane 0 — no lane realignment.
    b0 = b[:h0, :]                         # (h0, 1)
    b1 = b[h0:h0 + h1, :]                  # (h1, 1)
    b2 = b[h0 + h1:, :]                    # (out_dim, 1)

    # Layer 0: W0^T @ x + b0_eff (ref contribution already folded into b0).
    a = jnp.tanh(
        jnp.dot(w0_ref[...], x, preferred_element_type=jnp.float32) + b0)

    # Layer 1: Linear + tanh (activations stay f32; weights up-cast if bf16).
    a = jnp.tanh(
        jnp.dot(w1_ref[...].astype(jnp.float32), a,
                preferred_element_type=jnp.float32) + b1)

    # Output layer: Linear, no activation.  (out_dim, TB) — lane-dense store.
    out = jnp.dot(w2_ref[...].astype(jnp.float32), a,
                  preferred_element_type=jnp.float32) + b2
    out_ref[...] = out.astype(out_ref.dtype)


def pack_kernel_params(params, ref, obs_dim, *, stream_dtype=jnp.float32):
    """One-time parameter prep (redo whenever `ref` changes).

    Folds the ref contribution of the concat-matmul into the first bias:
        concat(obs, ref) @ W0 + b0 == obs @ W0[:obs_dim] + (b0 + ref @ W0[obs_dim:])
    transposes all weights to feature-major, optionally down-casts streamed
    operands to `stream_dtype` (e.g. bf16), and packs the three biases into a
    single sublane-sliced f32 column.
    """
    w0, b0 = params["w0"], params["b0"]
    w1, b1 = params["w1"], params["b1"]
    w2, b2 = params["w2"], params["b2"]

    ref = jnp.asarray(ref, jnp.float32).reshape(1, -1)
    b0_eff = b0.reshape(1, -1) + ref @ w0[obs_dim:, :]          # (1, h0)

    b_packed = jnp.concatenate(
        [b0_eff.reshape(-1), b1.reshape(-1), b2.reshape(-1)]
    )[:, None].astype(jnp.float32)                              # (h0+h1+out, 1)

    w0_t = w0[:obs_dim, :].T.astype(stream_dtype)               # (h0, obs_dim)
    w1_t = w1.T.astype(stream_dtype)                            # (h1, h0)
    w2_t = w2.T.astype(stream_dtype)                            # (out_dim, h1)
    return w0_t, b_packed, w1_t, w2_t


def _critic_jnp(obs, packed):
    """Plain-XLA fast path for tiny batches (launch overhead > kernel work)."""
    w0_t, b_packed, w1_t, w2_t = packed
    h0 = w0_t.shape[0]
    h1 = w1_t.shape[0]
    f32 = jnp.float32
    b0 = b_packed[:h0, 0]
    b1 = b_packed[h0:h0 + h1, 0]
    b2 = b_packed[h0 + h1:, 0]
    h = jnp.tanh(obs.astype(f32) @ w0_t.T.astype(f32) + b0)
    h = jnp.tanh(h @ w1_t.T.astype(f32) + b1)
    return h @ w2_t.T.astype(f32) + b2


def critic_forward(obs, packed, *, block_b=4096, min_pallas_rows=256,
                   force_pallas=False, obs_transposed=False,
                   return_transposed=False):
    """obs: (B, obs_dim) (or (obs_dim, B) if obs_transposed);
    packed = pack_kernel_params(...) output.  Returns (B, out_dim) f32
    (or (out_dim, B) if return_transposed)."""
    w0_t, b_packed, w1_t, w2_t = packed
    h0, obs_dim = w0_t.shape
    h1, h0_chk = w1_t.shape
    out_dim, h1_chk = w2_t.shape
    total_b = h0 + h1 + out_dim

    # Guard against mismatched packings (a stale `ref` cannot be detected here;
    # re-pack whenever ref changes).
    assert h0_chk == h0 and h1_chk == h1, "packed weights are inconsistent"
    assert b_packed.shape == (total_b, 1), "packed biases have the wrong shape"

    if obs_transposed:
        assert obs.shape[0] == obs_dim, "obs feature dim does not match packing"
        batch = obs.shape[1]
    else:
        assert obs.shape[-1] == obs_dim, "obs feature dim does not match packing"
        batch = obs.shape[0]

    # Tiny-batch fast path: three small fused dots beat a pallas_call launch.
    if batch <= min_pallas_rows and not force_pallas:
        obs_bm = obs.T if obs_transposed else obs
        out = _critic_jnp(obs_bm, packed)
        return out.T if return_transposed else out

    # Feature-major (lane-dense) input.  Ideally the producer already emits obs
    # as (obs_dim, B) (pass obs_transposed=True); otherwise this is one cheap
    # XLA transpose (+cast for bf16 streaming) outside the kernel.
    obs_t = obs if obs_transposed else obs.T
    obs_t = obs_t.astype(w0_t.dtype)

    # Batch-tile choice:
    #  * as large as possible (per-step overhead ~0.35us; VMEM is not a concern
    #    even on v7x's 64 MiB at these widths),
    #  * >= 2 grid steps for large batches so "parallel" megacore sharding can
    #    split work across v7x's two TensorCores,
    #  * a multiple of 256 so the (out_dim, tb) output store stays unmasked and
    #    lane-dense (and 8|tb for sublane alignment).
    if batch <= 256:
        tb = batch                                   # forced single-block path
    else:
        tb = min(block_b, _round_up(pl.cdiv(batch, 2), 256))
    grid = (pl.cdiv(batch, tb),)

    kernel = functools.partial(critic_kernel, h0=h0, h1=h1)

    out_t = pl.pallas_call(
        kernel,
        out_shape=jax.ShapeDtypeStruct((out_dim, batch), jnp.float32),
        grid_spec=pltpu.PrefetchScalarGridSpec(
            num_scalar_prefetch=0,
            grid=grid,
            in_specs=[
                pl.BlockSpec((obs_dim, tb), lambda i: (0, i)),    # obs tile
                pl.BlockSpec((h0, obs_dim), lambda i: (0, 0)),    # W0^T (resident)
                pl.BlockSpec((total_b, 1), lambda i: (0, 0)),     # packed biases
                pl.BlockSpec((h1, h0), lambda i: (0, 0)),         # W1^T (resident)
                pl.BlockSpec((out_dim, h1), lambda i: (0, 0)),    # W2^T (resident)
            ],
            out_specs=pl.BlockSpec((out_dim, tb), lambda i: (0, i)),
        ),
        compiler_params=pltpu.CompilerParams(
            dimension_semantics=("parallel",)),                   # megacore on v7x
    )(obs_t, w0_t, b_packed, w1_t, w2_t)

    return out_t if return_transposed else out_t.T


def init_params(key, input_dim, hidden_dims, output_dim):
    """Deterministic init mimicking nn.Linear's U(-1/sqrt(fan_in), 1/sqrt(fan_in)).
    Weights are stored as (in_features, out_features)."""
    dims = [input_dim] + list(hidden_dims) + [output_dim]
    params = {}
    for i, (fan_in, fan_out) in enumerate(zip(dims[:-1], dims[1:])):
        key, kw, kb = jax.random.split(key, 3)
        bound = 1.0 / jnp.sqrt(float(fan_in))
        params[f"w{i}"] = jax.random.uniform(
            kw, (fan_in, fan_out), jnp.float32, -bound, bound)
        params[f"b{i}"] = jax.random.uniform(
            kb, (1, fan_out), jnp.float32, -bound, bound)
    return params


def critic_reference(obs, ref, params):
    """Pure-JAX reference matching the PyTorch forward pass exactly."""
    exp_ref = jnp.broadcast_to(ref, obs.shape[:-1] + ref.shape[-1:])
    x = jnp.concatenate([obs, exp_ref], axis=-1)
    h = jnp.tanh(x @ params["w0"] + params["b0"])
    h = jnp.tanh(h @ params["w1"] + params["b1"])
    return h @ params["w2"] + params["b2"]


if __name__ == "__main__":
    # Small, module-consistent shapes.
    batch = 8
    obs_dim = 24
    ref_dim = 8
    input_dim = obs_dim + ref_dim          # Critic input_dim = obs_dim + ref_dim
    hidden_dims = (32, 32)
    output_dim = 3

    key = jax.random.PRNGKey(0)
    k_obs, k_ref, k_par, k_big = jax.random.split(key, 4)

    obs = jax.random.normal(k_obs, (batch, obs_dim), jnp.float32)
    ref = jax.random.normal(k_ref, (1, ref_dim), jnp.float32)
    params = init_params(k_par, input_dim, hidden_dims, output_dim)

    packed = pack_kernel_params(params, ref, obs_dim)
    expected = critic_reference(obs, ref, params)

    # 1) Tiny batch forced through the Pallas kernel (single-block path).
    out = jax.block_until_ready(critic_forward(obs, packed, force_pallas=True))
    assert out.shape == (batch, output_dim)
    assert jnp.allclose(out, expected, atol=1e-5, rtol=1e-5), (
        f"max abs err {jnp.max(jnp.abs(out - expected))}")

    # 2) Tiny-batch fast path (plain XLA) must agree as well.
    out_fast = jax.block_until_ready(critic_forward(obs, packed))
    assert jnp.allclose(out_fast, expected, atol=1e-5, rtol=1e-5), (
        f"max abs err {jnp.max(jnp.abs(out_fast - expected))}")

    # 3) Larger batch: gridded Pallas path (>=2 "parallel" steps, partial last
    #    tile exercises masked-edge writeback).
    big = 1600
    obs_big = jax.random.normal(k_big, (big, obs_dim), jnp.float32)
    expected_big = critic_reference(obs_big, ref, params)
    out_big = jax.block_until_ready(critic_forward(obs_big, packed))
    assert out_big.shape == (big, output_dim)
    assert jnp.allclose(out_big, expected_big, atol=1e-5, rtol=1e-5), (
        f"max abs err {jnp.max(jnp.abs(out_big - expected_big))}")

    # 4) bf16-streamed variant (halves the obs HBM read; looser tolerance since
    #    inputs/weights are rounded to bf16 — accumulation stays f32).
    packed_bf16 = pack_kernel_params(params, ref, obs_dim,
                                     stream_dtype=jnp.bfloat16)
    out_bf16 = jax.block_until_ready(critic_forward(obs_big, packed_bf16))
    assert out_bf16.shape == (big, output_dim)
    assert jnp.allclose(out_bf16, expected_big, atol=5e-2, rtol=5e-2), (
        f"max abs err {jnp.max(jnp.abs(out_bf16 - expected_big))}")

    print("KERNEL_OK")
</pallas_src>

<mosaic_0001>
module attributes {stable_mosaic.version = 11 : i64} {
  func.func @critic_kernel(%arg0: i32, %arg1: memref<24x8xf32, #tpu.memory_space<vmem>>, %arg2: memref<32x24xf32, #tpu.memory_space<vmem>>, %arg3: memref<67x1xf32, #tpu.memory_space<vmem>>, %arg4: memref<32x32xf32, #tpu.memory_space<vmem>>, %arg5: memref<3x32xf32, #tpu.memory_space<vmem>>, %arg6: memref<3x8xf32, #tpu.memory_space<vmem>>) attributes {dimension_semantics = [#tpu.dimension_semantics<parallel>], iteration_bounds = array<i64: 1>, scalar_prefetch = 0 : i64, scratch_operands = 0 : i64, tpu.core_type = #tpu.core_type<tc>, window_params = [{transform_indices = @transform_0, window_bounds = array<i64: 24, 8>}, {pipeline_mode = #tpu.pipeline_mode<synchronous>, transform_indices = @transform_1, window_bounds = array<i64: 32, 24>}, {pipeline_mode = #tpu.pipeline_mode<synchronous>, transform_indices = @transform_2, window_bounds = array<i64: 67, 1>}, {pipeline_mode = #tpu.pipeline_mode<synchronous>, transform_indices = @transform_3, window_bounds = array<i64: 32, 32>}, {pipeline_mode = #tpu.pipeline_mode<synchronous>, transform_indices = @transform_4, window_bounds = array<i64: 3, 32>}, {transform_indices = @transform_5, window_bounds = array<i64: 3, 8>}]} {
    %c0 = arith.constant 0 : index
    %c0_0 = arith.constant 0 : index
    %0 = vector.load %arg1[%c0, %c0_0] : memref<24x8xf32, #tpu.memory_space<vmem>>, vector<24x8xf32>
    %c0_1 = arith.constant 0 : index
    %c0_2 = arith.constant 0 : index
    %1 = vector.load %arg3[%c0_1, %c0_2] : memref<67x1xf32, #tpu.memory_space<vmem>>, vector<67x1xf32>
    %2 = vector.extract_strided_slice %1 {offsets = [0, 0], sizes = [32, 1], strides = [1, 1]} : vector<67x1xf32> to vector<32x1xf32>
    %3 = vector.extract_strided_slice %1 {offsets = [32, 0], sizes = [32, 1], strides = [1, 1]} : vector<67x1xf32> to vector<32x1xf32>
    %4 = vector.extract_strided_slice %1 {offsets = [64, 0], sizes = [3, 1], strides = [1, 1]} : vector<67x1xf32> to vector<3x1xf32>
    %c0_3 = arith.constant 0 : index
    %c0_4 = arith.constant 0 : index
    %5 = vector.load %arg2[%c0_3, %c0_4] : memref<32x24xf32, #tpu.memory_space<vmem>>, vector<32x24xf32>
    %cst = arith.constant dense<0.000000e+00> : vector<32x8xf32>
    %6 = tpu.matmul %5, %0, %cst {dimension_numbers = #tpu.dot_dimension_numbers<[1], [0], [0], [1], [0, 0, 1, 1], [], []>} : vector<32x24xf32>, vector<24x8xf32>, vector<32x8xf32> -> vector<32x8xf32>
    %7 = vector.broadcast %2 : vector<32x1xf32> to vector<32x8xf32>
    %8 = arith.addf %6, %7 : vector<32x8xf32>
    %9 = math.tanh %8 : vector<32x8xf32>
    %c0_5 = arith.constant 0 : index
    %c0_6 = arith.constant 0 : index
    %10 = vector.load %arg4[%c0_5, %c0_6] : memref<32x32xf32, #tpu.memory_space<vmem>>, vector<32x32xf32>
    %cst_7 = arith.constant dense<0.000000e+00> : vector<32x8xf32>
    %11 = tpu.matmul %10, %9, %cst_7 {dimension_numbers = #tpu.dot_dimension_numbers<[1], [0], [0], [1], [0, 0, 1, 1], [], []>} : vector<32x32xf32>, vector<32x8xf32>, vector<32x8xf32> -> vector<32x8xf32>
    %12 = vector.broadcast %3 : vector<32x1xf32> to vector<32x8xf32>
    %13 = arith.addf %11, %12 : vector<32x8xf32>
    %14 = math.tanh %13 : vector<32x8xf32>
    %c0_8 = arith.constant 0 : index
    %c0_9 = arith.constant 0 : index
    %15 = vector.load %arg5[%c0_8, %c0_9] : memref<3x32xf32, #tpu.memory_space<vmem>>, vector<3x32xf32>
    %cst_10 = arith.constant dense<0.000000e+00> : vector<3x8xf32>
    %16 = tpu.matmul %15, %14, %cst_10 {dimension_numbers = #tpu.dot_dimension_numbers<[1], [0], [0], [1], [0, 0, 1, 1], [], []>} : vector<3x32xf32>, vector<32x8xf32>, vector<3x8xf32> -> vector<3x8xf32>
    %17 = vector.broadcast %4 : vector<3x1xf32> to vector<3x8xf32>
    %18 = arith.addf %16, %17 : vector<3x8xf32>
    %c0_11 = arith.constant 0 : index
    %c0_12 = arith.constant 0 : index
    %19 = vector.load %arg6[%c0_11, %c0_12] : memref<3x8xf32, #tpu.memory_space<vmem>>, vector<3x8xf32>
    tpu.vector_store %arg6[%c0_11, %c0_12], %18 {strides = array<i32>} : memref<3x8xf32, #tpu.memory_space<vmem>>, vector<3x8xf32>,
    return
  }
  func.func @transform_0(%arg0: i32) -> (i32, i32) {
    %c0_i32 = arith.constant 0 : i32
    %c0_i32_0 = arith.constant 0 : i32
    return %c0_i32, %arg0 : i32, i32
  }
  func.func @transform_1(%arg0: i32) -> (i32, i32) {
    %c0_i32 = arith.constant 0 : i32
    %c0_i32_0 = arith.constant 0 : i32
    %c0_i32_1 = arith.constant 0 : i32
    return %c0_i32, %c0_i32_0 : i32, i32
  }
  func.func @transform_2(%arg0: i32) -> (i32, i32) {
    %c0_i32 = arith.constant 0 : i32
    %c0_i32_0 = arith.constant 0 : i32
    %c0_i32_1 = arith.constant 0 : i32
    return %c0_i32, %c0_i32_0 : i32, i32
  }
  func.func @transform_3(%arg0: i32) -> (i32, i32) {
    %c0_i32 = arith.constant 0 : i32
    %c0_i32_0 = arith.constant 0 : i32
    %c0_i32_1 = arith.constant 0 : i32
    return %c0_i32, %c0_i32_0 : i32, i32
  }
  func.func @transform_4(%arg0: i32) -> (i32, i32) {
    %c0_i32 = arith.constant 0 : i32
    %c0_i32_0 = arith.constant 0 : i32
    %c0_i32_1 = arith.constant 0 : i32
    return %c0_i32, %c0_i32_0 : i32, i32
  }
  func.func @transform_5(%arg0: i32) -> (i32, i32) {
    %c0_i32 = arith.constant 0 : i32
    %c0_i32_0 = arith.constant 0 : i32
    return %c0_i32, %arg0 : i32, i32
  }
}

</mosaic_0001>

<bundles_post_ra>
// kernel: tpu_custom_call.1
= control target key start
LH: loop header
LB: loop body
LE: loop exit
PB: predicated region body
PF: predicated region fallthrough
CT: control target
= control target key end

     0   :  { %vm57_vm0 = vcmask 195584   ;;  %v490_v3 = vmov 0   ;;  %s599_s0 = inlined_call_operand.vmem [shape: f32[24,8], index: 0, kind: input, shape index: {}]   ;;  %s600_s1 = inlined_call_operand.vmem [shape: f32[32,24], index: 1, kind: input, shape index: {}]   ;;  %s601_s2 = inlined_call_operand.vmem [shape: f32[67,1], index: 2, kind: input, shape index: {}]   ;;  %s602_s3 = inlined_call_operand.vmem [shape: f32[32,32], index: 3, kind: input, shape index: {}]   ;;  %s603_s4 = inlined_call_operand.vmem [shape: f32[3,32], index: 4, kind: input, shape index: {}]   ;;  %s604_s5 = inlined_call_operand.hbm [shape: f32[3,8], index: 5, kind: output, shape index: {}]  }
   0x1   :  { %v23_v0 = vld [vmem:[%s599_s0 + $0x10] sm:$0xff]  ;;  %v22_v1 = vld [vmem:[%s599_s0 + $0x8] sm:$0xff]  ;;  %v33_v2 = vld [vmem:[%s600_s1] sm:$0xff]  ;;  %450 = vset.pattern.permute.xlu0 %v490_v3  ;;  %451 = vset.pattern.permute.xlu1 %v490_v3 }
   0x2   :  { %409 = vmatprep.subr.mxu0 %v23_v0  ;;  %v21_v4 = vld [vmem:[%s599_s0] sm:$0xff]  ;;  %415 = vmatprep.mubr.msk.f32.mxu0 %vm57_vm0, %v33_v2  ;;  %v27_v5 = vld [vmem:[%s601_s2 + $0x18] sm:$0xff]  ;;  %v25_v6 = vld [vmem:[%s601_s2 + $0x8] sm:$0xff] }
   0x3   :  { %410 = vmatpush3.msra.mxu0 %v23_v0  ;;  %54 = vperm.xlu0 %450, %v27_v5   ;;  %v34_v7 = vld [vmem:[%s600_s1 + $0x8] sm:$0xff]  ;;  %v26_v8 = vld [vmem:[%s601_s2 + $0x10] sm:$0xff] }
   0x4   :  { %411 = vmatprep.subr.mxu0 %v22_v1  ;;  %v35_v9 = vld [vmem:[%s600_s1 + $0x10] sm:$0xff]  ;;  %44 = vperm.xlu1 %451, %v25_v6  }
   0x5   :  { %412 = vmatpush3.msra.mxu0 %v22_v1 }
   0x6   :  { %413 = vmatprep.subr.mxu0 %v21_v4 }
   0x7   :  { %10 = vsyncpa [#allocation3], 0  ;;  %414 = vmatpush3.msra.mxu0 %v21_v4  ;;  %v24_v10 = vld [vmem:[%s601_s2] sm:$0xff]  ;;  %49 = vperm.xlu0 %450, %v26_v8   ;;  %v36_v11 = vld [vmem:[%s600_s1 + $0x18] sm:$0xff]  ;;  %vm183_vm1 = vcmask 261120   ;;  %v491_v37 = vmov 0.0  }
   0x8   :  { %416 = vmatmul.mubr.msk.f32.vlgmr.msra.gmra.mxu0 %vm57_vm0, %v34_v7  ;;  %v31_v12 = vld [vmem:[%s601_s2 + $0x38] sm:$0xff]  ;;  %39 = vperm.xlu1 %451, %v24_v10   ;;  %v30_v13 = vld [vmem:[%s601_s2 + $0x30] sm:$0xff]  ;;  %v29_v14 = vld [vmem:[%s601_s2 + $0x28] sm:$0xff]  ;;  %vm492_vm2 = vmmov 0   ;;  %s493_s6 = smov [#allocation2]   ;;  %vm364_vm3 = vcmask 59392  }
   0x9   :  { %418 = vmatprep.mubr.msk.f32.mxu0 %vm57_vm0, %v35_v9  ;;  %v28_v15 = vld [vmem:[%s601_s2 + $0x20] sm:$0xff]  ;;  %v160_v34 = vld [vmem:[%s602_s3 + $0x8] sm:$0xff]  ;;  %v161_v35 = vld [vmem:[%s602_s3 + $0x10] sm:$0xff]  ;;  %435 = vmatprep.subr.mxu0 %v491_v37  ;;  %s372_s7 = sshll.u32 %s493_s6, 4  ;;  %s373_s7 = int_to_ptr.vmem [resolvable:$true] %s372_s7 }
   0xa   :  { %v32_v16 = vld [vmem:[%s601_s2 + $0x40] sm:$0x7]  ;;  %v162_v36 = vld [vmem:[%s602_s3 + $0x18] sm:$0xff]  ;;  %s468_s8 = scalar_lea.vmem %s373_s7, 64  ;;  %p473_p1 = scmp.lt.s32.totalorder %s373_s7, %s373_s7 }
   0xb   :  { %180 = vperm.xlu0 %450, %v31_v12   ;;  %v159_v17 = vld [vmem:[%s602_s3] sm:$0xff]  ;;  %p469_p0 = scmp.ne.s32.totalorder %s373_s7, %s468_s8  ;;  %p474_p2 = scmp.lt.s32.totalorder %s468_s8, %s468_s8 }
   0xc   :  { %419 = vmatmul.mubr.msk.f32.gmra.mxu0 %vm57_vm0, %v36_v11  ;;  %175 = vperm.xlu1 %451, %v30_v13   ;;  %v285_v53 = vld [vmem:[%s603_s4] sm:$0x7] }
   0xd   :  { %429 = vmatprep.mubr.msk.f32.mxu1 %vm183_vm1, %v159_v17  ;;  %443 = vmatprep.mubr.msk.f32.mxu0 %vm492_vm2, %v491_v37  ;;  %p475_p3 = por %p474_p2, %p473_p1 }
   0xf   :  { %170 = vperm.xlu0 %450, %v29_v14   ;;  %p476_p4 = pnand %p475_p3, %p469_p0 }
  0x10   :  { %165 = vperm.xlu1 %451, %v28_v15  }
  0x13   :  { %288 = vperm.xlu0 %450, %v32_v16  }
  0x7e   :  { %v55_v18 = vpop.permute.xlu0 %54 }
  0x7f   :  { %v45_v20 = vpop.permute.xlu1 %44 }
  0x82   :  { %v50_v24 = vpop.permute.xlu0 %49 }
  0x83   :  { %v40_v28 = vpop.permute.xlu1 %39 }
  0x86   :  { %v181_v38 = vpop.permute.xlu0 %180 }
  0x87   :  { %v176_v40 = vpop.permute.xlu1 %175 }
  0x8a   :  { %v171_v44 = vpop.permute.xlu0 %170 }
  0x8b   :  { %v166_v48 = vpop.permute.xlu1 %165 }
  0x8e   :  { %v289_v55 = vpop.permute.xlu0 %288 }
  0xc8   :  { %v417_v19 = vpop.f32.mrf.mxu0 }
  0xc9   :  { %v142_v26 = vadd.f32 %v417_v19, %v45_v20 }
  0xca   :  { %v136_v21 = vpop.f32.mrf.mxu0 }
  0xcb   :  { %v137_v29 = vadd.f32 %v136_v21, %v40_v28 }
  0xcc   :  { %v420_v22 = vpop.f32.mrf.mxu0 }
  0xcd   :  { %v152_v23 = vadd.f32 %v420_v22, %v55_v18 }
  0xce   :  { %v146_v25 = vpop.f32.mrf.mxu0 }
  0xcf   :  { %452 = vtanh.f32 %v152_v23  ;;  %v147_v27 = vadd.f32 %v146_v25, %v50_v24 }
  0xd1   :  { %454 = vtanh.f32 %v147_v27 }
  0xd2   :  { %456 = vtanh.f32 %v142_v26 }
  0xd3   :  { %458 = vtanh.f32 %v137_v29 }
  0xdc   :  { %v453_v30 = vpop.eup %452 }
  0xdd   :  { %421 = vmatprep.subr.mxu1 %v453_v30 }
  0xde   :  { %v455_v31 = vpop.eup %454  ;;  %422 = vmatpush3.msra.mxu1 %v453_v30 }
  0xdf   :  { %423 = vmatprep.subr.mxu1 %v455_v31  ;;  %v457_v32 = vpop.eup %456 }
  0xe0   :  { %424 = vmatpush3.msra.mxu1 %v455_v31  ;;  %v459_v33 = vpop.eup %458 }
  0xe1   :  { %425 = vmatprep.subr.mxu1 %v457_v32 }
  0xe2   :  { %426 = vmatpush3.msra.mxu1 %v457_v32 }
  0xe3   :  { %427 = vmatprep.subr.mxu1 %v459_v33 }
  0xe4   :  { %428 = vmatpush3.msra.mxu1 %v459_v33 }
  0xe5   :  { %430 = vmatmul.mubr.msk.f32.vlgmr.msra.gmra.mxu1 %vm183_vm1, %v160_v34 }
  0xe6   :  { %432 = vmatprep.mubr.msk.f32.mxu1 %vm183_vm1, %v161_v35 }
  0xe9   :  { %433 = vmatmul.mubr.msk.f32.gmra.mxu1 %vm183_vm1, %v162_v36 }
 0x1a5   :  { %v431_v39 = vpop.f32.mrf.mxu1 }
 0x1a6   :  { %v268_v46 = vadd.f32 %v431_v39, %v171_v44 }
 0x1a7   :  { %v262_v41 = vpop.f32.mrf.mxu1 }
 0x1a8   :  { %v263_v49 = vadd.f32 %v262_v41, %v166_v48 }
 0x1a9   :  { %v434_v42 = vpop.f32.mrf.mxu1 }
 0x1aa   :  { %v278_v43 = vadd.f32 %v434_v42, %v181_v38 }
 0x1ab   :  { %v272_v45 = vpop.f32.mrf.mxu1 }
 0x1ac   :  { %460 = vtanh.f32 %v278_v43  ;;  %v273_v47 = vadd.f32 %v272_v45, %v176_v40 }
 0x1ae   :  { %462 = vtanh.f32 %v273_v47 }
 0x1af   :  { %464 = vtanh.f32 %v268_v46 }
 0x1b0   :  { %466 = vtanh.f32 %v263_v49 }
 0x1b9   :  { %v461_v50 = vpop.eup %460 }
 0x1ba   :  { %436 = vmatpush3.msra.mxu0 %v461_v50 }
 0x1bb   :  { %v463_v51 = vpop.eup %462  ;;  %437 = vmatprep.subr.mxu0 %v491_v37 }
 0x1bc   :  { %438 = vmatpush3.msra.mxu0 %v463_v51  ;;  %v465_v52 = vpop.eup %464 }
 0x1bd   :  { %439 = vmatprep.subr.mxu0 %v491_v37  ;;  %v467_v54 = vpop.eup %466 }
 0x1be   :  { %440 = vmatpush3.msra.mxu0 %v465_v52 }
 0x1bf   :  { %441 = vmatprep.subr.mxu0 %v491_v37 }
 0x1c0   :  { %442 = vmatpush3.msra.mxu0 %v467_v54 }
 0x1c1   :  { %444 = vmatmul.mubr.msk.f32.vlgmr.msra.gmra.mxu0 %vm183_vm1, %v285_v53 }
 0x281   :  { %v360_v56 = vpop.f32.mrf.mxu0 }
 0x282   :  { %v361_v57 = vadd.f32 %v360_v56, %v289_v55 }
 0x283   :  { %v445_v58 = vpop.f32.mrf.mxu0 }
 0x284   :  { %365 = vst.msk [vmem:[#allocation2] sm:$0x7] %vm364_vm3, %v361_v57 }
 0x285   :  { %479 = shalt.err (!%p476_p4)
}
 0x286   :  { %375 = dma.vmem_to_hbm [thread:$0]  %s373_s7, 64, %s604_s5, [#allocation3]  }
 0x287   :  { %488 = dma.done.wait [#allocation3], 64  }
 0x288   :  { %489 = vsyncadd [#allocation3], 4294967232 }
 0x289   :  { %379 = vsyncpa [#allocation3], 1 }

</bundles_post_ra>
